<compile_context>
chip_gen: v6e
topology: v6e:2x2x1
jax: 0.10.0
libtpu: 0.0.40
codegen_flags: <defaults>
</compile_context>

<pallas_src>
import functools

import jax
import jax.numpy as jnp
from jax import lax
from jax.experimental import pallas as pl
from jax.experimental.pallas import tpu as pltpu

EPS = 1e-5


def _act(y, slope):
    # slope == 0.0 -> ReLU, else LeakyReLU(slope)   (config.nonlin in PyTorch)
    if slope == 0.0:
        return jnp.maximum(y, 0.0)
    return jnp.where(y > 0, y, slope * y)


# ------------------------------ fused kernel --------------------------------

def _sepconv_kernel(x_ref, w1_ref, b1_ref, wd_ref, b2_ref, o_ref, pad_ref, *,
                    Bt, H, W, Cout, K, P, S, slope):
    """Bt images per grid step, everything stays in VMEM.

    x_ref   : (Bt, H, W*Cin)          folded NHWC input slab
    w1_ref  : (W*Cin, W*Cout)         kron(I_W, w_pw * bn1_scale)
    b1_ref  : (1, W*Cout)             bn1 bias tiled over W
    wd_ref  : (K, W*Cout, Wo*Cout)    per-dh depthwise+stride matrix * bn2_scale
    b2_ref  : (1, Wo*Cout)            bn2 bias tiled over Wo
    o_ref   : (Bt, Ho, Wo*Cout)       folded output slab (lane dense)
    pad_ref : (Bt, H+2P, W*Cout)      VMEM scratch, row halo only (lane-aligned)
    """
    WC = W * Cout
    Ho = (H + 2 * P - K) // S + 1
    Wo = (W + 2 * P - K) // S + 1

    # ---- 1x1 conv (+ folded BN1 scale) + bias + nonlin : one MXU matmul ----
    x2 = x_ref[...].reshape(Bt * H, -1)                     # (Bt*H, W*Cin)
    h2 = jnp.dot(x2, w1_ref[...], preferred_element_type=jnp.float32)
    h2 = _act(h2 + b1_ref[...], slope)                      # (Bt*H, W*Cout)

    # ---- row-halo scratch; lane width == WC so every access is lane-aligned.
    # Only the 2*P halo rows are zeroed (interior fully overwritten each step).
    if P > 0:
        pad_ref[:, :P, :] = jnp.zeros((Bt, P, WC), jnp.float32)
        pad_ref[:, P + H:2 * P + H, :] = jnp.zeros((Bt, P, WC), jnp.float32)
    pad_ref[:, P:P + H, :] = h2.reshape(Bt, H, WC)

    # ---- KxK depthwise (+ folded BN2 scale): the dw taps, per-channel
    # weights and W-stride live in wd_ref -> K row shifts + K small MXU
    # matmuls; no lane shifts, no masks, no lane-misaligned loads. -----------
    acc = None
    for dh in range(K):
        if S == 1:
            tap = pad_ref[:, dh:dh + Ho, :]
        else:
            tap = pad_ref[:, pl.ds(dh, Ho, S), :]           # row-strided taps
        part = jnp.dot(tap.reshape(Bt * Ho, WC), wd_ref[dh],
                       preferred_element_type=jnp.float32)
        acc = part if acc is None else acc + part
    y = _act(acc + b2_ref[...], slope)
    o_ref[...] = y.reshape(Bt, Ho, Wo * Cout).astype(o_ref.dtype)


# ------------------------------ trace-time folds -----------------------------

def _fold_bn(bn):
    g, b, m, v = bn
    scale = g / jnp.sqrt(v + EPS)
    bias = b - m * scale
    return scale, bias


def _depthwise_matrices(wd_scaled, W, Wo, K, P, S):
    """Fold dw taps + per-channel weights + W-stride into K (W*C, Wo*C) mats.

    M[dh, wi*C + ci, wo*C + co] = wd_scaled[dh, wi - (wo*S - P), ci] if ci==co
                                  and 0 <= wi - (wo*S - P) < K, else 0.
    """
    C = wd_scaled.shape[-1]
    wi = jnp.arange(W)[:, None]                    # (W, 1)
    wo = jnp.arange(Wo)[None, :]                   # (1, Wo)
    dw = wi - (wo * S - P)                         # (W, Wo) tap index
    valid = (dw >= 0) & (dw < K)
    dw_c = jnp.clip(dw, 0, K - 1)
    vals = wd_scaled[:, dw_c, :] * valid[None, :, :, None]     # (K, W, Wo, C)
    eye_c = jnp.eye(C, dtype=wd_scaled.dtype)
    m = vals[:, :, :, :, None] * eye_c[None, None, None, :, :]  # (K,W,Wo,C,C)
    return m.transpose(0, 1, 3, 2, 4).reshape(K, W * C, Wo * C)


def _default_batch_tile(n):
    # One grid step per TensorCore: 2-TC chips (v7x / v4 / v5p megacore) get a
    # 2-step "parallel" grid; single-TC v5e/v6e get everything in one step.
    try:
        kind = jax.devices()[0].device_kind.lower()
    except Exception:
        kind = ""
    two_cores = any(t in kind for t in ("v7", "7x", "v4", "v5p"))
    if two_cores and n >= 2 and n % 2 == 0:
        return n // 2
    return n


# ------------------------------ wrapper --------------------------------------

def sepconv_bn_act_pallas(x, params, *, kernel_size=3, stride=1, padding=1,
                          nonlin="relu", data_format="NCHW", batch_tile=None,
                          out_dtype=None):
    slope = 0.0 if nonlin == "relu" else 0.01
    K, P, S = kernel_size, padding, stride

    if data_format == "NCHW":
        # PyTorch-interface boundary only; chain blocks in NHWC to skip this.
        x = jnp.transpose(x, (0, 2, 3, 1))
    n, h, w, cin = x.shape
    cout = params["w_pw"].shape[1]
    ho = (h + 2 * P - K) // S + 1
    wo = (w + 2 * P - K) // S + 1
    out_dtype = out_dtype or x.dtype

    # Lane-density guard: folded hidden rows must be full 128-lane multiples
    # so the kernel's loads/stores are unmasked full-width vld/vst.
    assert (w * cout) % 128 == 0, (
        f"W*Cout={w * cout} must be a multiple of 128 for lane-dense layout")

    # Fold BN scales into conv weights at trace time (inference / running
    # stats form; training-mode batch statistics are not modeled here).
    f32 = jnp.float32
    s1, b1 = _fold_bn(params["bn1"])
    s2, b2 = _fold_bn(params["bn2"])
    w1s = params["w_pw"].astype(f32) * s1[None, :]                 # (Cin, Cout)
    w1_kron = jnp.kron(jnp.eye(w, dtype=f32), w1s)                 # (W*Cin, W*Cout)
    b1_f = jnp.tile(b1, w)[None, :]                                # (1, W*Cout)
    wd_s = params["w_dw"].astype(f32) * s2[None, None, :]          # (K, K, Cout)
    wd_mats = _depthwise_matrices(wd_s, w, wo, K, P, S)            # (K, W*Cout, Wo*Cout)
    b2_f = jnp.tile(b2, wo)[None, :]                               # (1, Wo*Cout)

    # Fold W into lanes; keep producer dtype (no f32 up-cast copy here).
    x_f = x.reshape(n, h, w * cin)

    bt = batch_tile or _default_batch_tile(n)
    assert n % bt == 0, (n, bt)
    steps = n // bt

    # Per-step VMEM footprint -> explicit limit (guardrail when scaling tiles,
    # especially for v7x's 64 MiB VMEM / 32 MiB scoped default).
    blk = 4 * (bt * h * w * cin + bt * ho * wo * cout + bt * (h + 2 * P) * w * cout)
    wts = 4 * (w1_kron.size + b1_f.size + wd_mats.size + b2_f.size)
    vmem_limit = int(min(64 << 20, max(16 << 20, 4 * (2 * blk + wts))))

    out_f = pl.pallas_call(
        functools.partial(_sepconv_kernel, Bt=bt, H=h, W=w, Cout=cout,
                          K=K, P=P, S=S, slope=slope),
        out_shape=jax.ShapeDtypeStruct((n, ho, wo * cout), out_dtype),
        grid=(steps,),
        in_specs=[
            pl.BlockSpec((bt, h, w * cin), lambda i: (i, 0, 0)),
            pl.BlockSpec((w * cin, w * cout), lambda i: (0, 0)),
            pl.BlockSpec((1, w * cout), lambda i: (0, 0)),
            pl.BlockSpec((K, w * cout, wo * cout), lambda i: (0, 0, 0)),
            pl.BlockSpec((1, wo * cout), lambda i: (0, 0)),
        ],
        out_specs=pl.BlockSpec((bt, ho, wo * cout), lambda i: (i, 0, 0)),
        scratch_shapes=[pltpu.VMEM((bt, h + 2 * P, w * cout), jnp.float32)],
        compiler_params=pltpu.CompilerParams(
            dimension_semantics=("parallel",),
            vmem_limit_bytes=vmem_limit),
    )(x_f, w1_kron, b1_f, wd_mats, b2_f)

    out = out_f.reshape(n, ho, wo, cout)
    if data_format == "NCHW":
        out = jnp.transpose(out, (0, 3, 1, 2))
    return out


# ------------------------------ pure-JAX reference ---------------------------

def sepconv_bn_act_ref(x_nchw, params, *, kernel_size=3, stride=1,
                       padding=1, nonlin="relu"):
    slope = 0.0 if nonlin == "relu" else 0.01
    x = jnp.transpose(x_nchw, (0, 2, 3, 1)).astype(jnp.float32)

    def bn_apply(y, bn):
        g, b, m, v = bn
        return (y - m) / jnp.sqrt(v + EPS) * g + b

    def act(y):
        return jnp.maximum(y, 0.0) if slope == 0.0 else jnp.where(y > 0, y, slope * y)

    hid = jnp.einsum("nhwc,cd->nhwd", x, params["w_pw"])
    hid = act(bn_apply(hid, params["bn1"]))
    cout = hid.shape[-1]
    wd = params["w_dw"][:, :, None, :]  # HWIO with I=1 (depthwise)
    hid = lax.conv_general_dilated(
        hid, wd, (stride, stride), ((padding, padding), (padding, padding)),
        dimension_numbers=("NHWC", "HWIO", "NHWC"), feature_group_count=cout)
    hid = act(bn_apply(hid, params["bn2"]))
    return jnp.transpose(hid, (0, 3, 1, 2))


# ------------------------------------ params ---------------------------------

def init_params(key, cin, cout, kernel_size=3):
    ks = jax.random.split(key, 12)

    def bn(c, i):
        g = 0.5 + jax.random.uniform(ks[i], (c,), jnp.float32)
        b = 0.1 * jax.random.normal(ks[i + 1], (c,), jnp.float32)
        m = 0.1 * jax.random.normal(ks[i + 2], (c,), jnp.float32)
        v = 0.5 + jax.random.uniform(ks[i + 3], (c,), jnp.float32)
        return g, b, m, v

    return {
        "w_pw": 0.2 * jax.random.normal(ks[0], (cin, cout), jnp.float32),
        "bn1": bn(cout, 1),
        "w_dw": 0.2 * jax.random.normal(ks[5], (kernel_size, kernel_size, cout),
                                        jnp.float32),
        "bn2": bn(cout, 6),
    }


# ------------------------------------ main ------------------------------------

if __name__ == "__main__":
    # SepConvBNAct(in_channels=4, out_channels=8), kernel=3, stride=1, pad=1.
    # (Cout=8, W=16 -> folded hidden/output lane width exactly 128.)
    N, CIN, COUT, H, W = 2, 4, 8, 16, 16
    K, STRIDE, PAD = 3, 1, 1

    key = jax.random.PRNGKey(0)
    kx, kp = jax.random.split(key)
    x = jax.random.normal(kx, (N, CIN, H, W), jnp.float32)  # NCHW like PyTorch
    params = init_params(kp, CIN, COUT, K)

    for nonlin in ("relu", "leaky_relu"):
        out = sepconv_bn_act_pallas(x, params, kernel_size=K, stride=STRIDE,
                                    padding=PAD, nonlin=nonlin)
        out = jax.block_until_ready(out)
        ref = sepconv_bn_act_ref(x, params, kernel_size=K, stride=STRIDE,
                                 padding=PAD, nonlin=nonlin)
        assert out.shape == (N, COUT, H, W), out.shape
        assert jnp.allclose(out, ref, rtol=1e-4, atol=1e-4), float(
            jnp.max(jnp.abs(out - ref)))

    print("KERNEL_OK")
</pallas_src>

<mosaic_0001>
module attributes {stable_mosaic.version = 11 : i64} {
  func.func @_sepconv_kernel(%arg0: i32, %arg1: memref<2x16x64xf32, #tpu.memory_space<vmem>>, %arg2: memref<64x128xf32, #tpu.memory_space<vmem>>, %arg3: memref<1x128xf32, #tpu.memory_space<vmem>>, %arg4: memref<3x128x128xf32, #tpu.memory_space<vmem>>, %arg5: memref<1x128xf32, #tpu.memory_space<vmem>>, %arg6: memref<2x16x128xf32, #tpu.memory_space<vmem>>, %arg7: memref<2x18x128xf32, #tpu.memory_space<vmem>>) attributes {dimension_semantics = [#tpu.dimension_semantics<parallel>], iteration_bounds = array<i64: 1>, scalar_prefetch = 0 : i64, scratch_operands = 1 : i64, tpu.core_type = #tpu.core_type<tc>, window_params = [{transform_indices = @transform_0, window_bounds = array<i64: 2, 16, 64>}, {pipeline_mode = #tpu.pipeline_mode<synchronous>, transform_indices = @transform_1, window_bounds = array<i64: 64, 128>}, {pipeline_mode = #tpu.pipeline_mode<synchronous>, transform_indices = @transform_2, window_bounds = array<i64: 1, 128>}, {pipeline_mode = #tpu.pipeline_mode<synchronous>, transform_indices = @transform_3, window_bounds = array<i64: 3, 128, 128>}, {pipeline_mode = #tpu.pipeline_mode<synchronous>, transform_indices = @transform_4, window_bounds = array<i64: 1, 128>}, {transform_indices = @transform_5, window_bounds = array<i64: 2, 16, 128>}]} {
    %c0 = arith.constant 0 : index
    %c0_0 = arith.constant 0 : index
    %c0_1 = arith.constant 0 : index
    %0 = vector.load %arg1[%c0, %c0_0, %c0_1] : memref<2x16x64xf32, #tpu.memory_space<vmem>>, vector<2x16x64xf32>
    %1 = vector.shape_cast %0 : vector<2x16x64xf32> to vector<32x64xf32>
    %c0_2 = arith.constant 0 : index
    %c0_3 = arith.constant 0 : index
    %2 = vector.load %arg2[%c0_2, %c0_3] : memref<64x128xf32, #tpu.memory_space<vmem>>, vector<64x128xf32>
    %cst = arith.constant dense<0.000000e+00> : vector<32x128xf32>
    %3 = tpu.matmul %1, %2, %cst {dimension_numbers = #tpu.dot_dimension_numbers<[1], [0], [0], [1], [0, 0, 1, 1], [], []>} : vector<32x64xf32>, vector<64x128xf32>, vector<32x128xf32> -> vector<32x128xf32>
    %c0_4 = arith.constant 0 : index
    %c0_5 = arith.constant 0 : index
    %4 = vector.load %arg3[%c0_4, %c0_5] : memref<1x128xf32, #tpu.memory_space<vmem>>, vector<1x128xf32>
    %5 = vector.broadcast %4 : vector<1x128xf32> to vector<32x128xf32>
    %6 = arith.addf %3, %5 : vector<32x128xf32>
    %cst_6 = arith.constant 0.000000e+00 : f32
    %7 = vector.broadcast %cst_6 : f32 to vector<32x128xf32>
    %8 = arith.maximumf %6, %7 : vector<32x128xf32>
    %cst_7 = arith.constant 0.000000e+00 : f32
    %9 = vector.broadcast %cst_7 : f32 to vector<2x1x128xf32>
    %c0_8 = arith.constant 0 : index
    %c0_9 = arith.constant 0 : index
    %c0_10 = arith.constant 0 : index
    %10 = vector.load %arg7[%c0_8, %c0_9, %c0_10] : memref<2x18x128xf32, #tpu.memory_space<vmem>>, vector<2x1x128xf32>
    tpu.vector_store %arg7[%c0_8, %c0_9, %c0_10], %9 {strides = array<i32>} : memref<2x18x128xf32, #tpu.memory_space<vmem>>, vector<2x1x128xf32>,
    %cst_11 = arith.constant 0.000000e+00 : f32
    %11 = vector.broadcast %cst_11 : f32 to vector<2x1x128xf32>
    %c0_12 = arith.constant 0 : index
    %c17 = arith.constant 17 : index
    %c0_13 = arith.constant 0 : index
    %12 = vector.load %arg7[%c0_12, %c17, %c0_13] : memref<2x18x128xf32, #tpu.memory_space<vmem>>, vector<2x1x128xf32>
    tpu.vector_store %arg7[%c0_12, %c17, %c0_13], %11 {strides = array<i32>} : memref<2x18x128xf32, #tpu.memory_space<vmem>>, vector<2x1x128xf32>,
    %13 = vector.shape_cast %8 : vector<32x128xf32> to vector<2x16x128xf32>
    %c0_14 = arith.constant 0 : index
    %c1 = arith.constant 1 : index
    %c0_15 = arith.constant 0 : index
    %14 = vector.load %arg7[%c0_14, %c1, %c0_15] : memref<2x18x128xf32, #tpu.memory_space<vmem>>, vector<2x16x128xf32>
    tpu.vector_store %arg7[%c0_14, %c1, %c0_15], %13 {strides = array<i32>} : memref<2x18x128xf32, #tpu.memory_space<vmem>>, vector<2x16x128xf32>,
    %c0_16 = arith.constant 0 : index
    %c0_17 = arith.constant 0 : index
    %c0_18 = arith.constant 0 : index
    %15 = vector.load %arg7[%c0_16, %c0_17, %c0_18] : memref<2x18x128xf32, #tpu.memory_space<vmem>>, vector<2x16x128xf32>
    %16 = vector.shape_cast %15 : vector<2x16x128xf32> to vector<32x128xf32>
    %c0_19 = arith.constant 0 : index
    %c0_20 = arith.constant 0 : index
    %c0_21 = arith.constant 0 : index
    %17 = vector.load %arg4[%c0_19, %c0_20, %c0_21] : memref<3x128x128xf32, #tpu.memory_space<vmem>>, vector<1x128x128xf32>
    %18 = vector.shape_cast %17 : vector<1x128x128xf32> to vector<128x128xf32>
    %cst_22 = arith.constant dense<0.000000e+00> : vector<32x128xf32>
    %19 = tpu.matmul %16, %18, %cst_22 {dimension_numbers = #tpu.dot_dimension_numbers<[1], [0], [0], [1], [0, 0, 1, 1], [], []>} : vector<32x128xf32>, vector<128x128xf32>, vector<32x128xf32> -> vector<32x128xf32>
    %c0_23 = arith.constant 0 : index
    %c1_24 = arith.constant 1 : index
    %c0_25 = arith.constant 0 : index
    %20 = vector.load %arg7[%c0_23, %c1_24, %c0_25] : memref<2x18x128xf32, #tpu.memory_space<vmem>>, vector<2x16x128xf32>
    %21 = vector.shape_cast %20 : vector<2x16x128xf32> to vector<32x128xf32>
    %c1_26 = arith.constant 1 : index
    %c0_27 = arith.constant 0 : index
    %c0_28 = arith.constant 0 : index
    %22 = vector.load %arg4[%c1_26, %c0_27, %c0_28] : memref<3x128x128xf32, #tpu.memory_space<vmem>>, vector<1x128x128xf32>
    %23 = vector.shape_cast %22 : vector<1x128x128xf32> to vector<128x128xf32>
    %cst_29 = arith.constant dense<0.000000e+00> : vector<32x128xf32>
    %24 = tpu.matmul %21, %23, %cst_29 {dimension_numbers = #tpu.dot_dimension_numbers<[1], [0], [0], [1], [0, 0, 1, 1], [], []>} : vector<32x128xf32>, vector<128x128xf32>, vector<32x128xf32> -> vector<32x128xf32>
    %25 = arith.addf %19, %24 : vector<32x128xf32>
    %c0_30 = arith.constant 0 : index
    %c2 = arith.constant 2 : index
    %c0_31 = arith.constant 0 : index
    %26 = vector.load %arg7[%c0_30, %c2, %c0_31] : memref<2x18x128xf32, #tpu.memory_space<vmem>>, vector<2x16x128xf32>
    %27 = vector.shape_cast %26 : vector<2x16x128xf32> to vector<32x128xf32>
    %c2_32 = arith.constant 2 : index
    %c0_33 = arith.constant 0 : index
    %c0_34 = arith.constant 0 : index
    %28 = vector.load %arg4[%c2_32, %c0_33, %c0_34] : memref<3x128x128xf32, #tpu.memory_space<vmem>>, vector<1x128x128xf32>
    %29 = vector.shape_cast %28 : vector<1x128x128xf32> to vector<128x128xf32>
    %cst_35 = arith.constant dense<0.000000e+00> : vector<32x128xf32>
    %30 = tpu.matmul %27, %29, %cst_35 {dimension_numbers = #tpu.dot_dimension_numbers<[1], [0], [0], [1], [0, 0, 1, 1], [], []>} : vector<32x128xf32>, vector<128x128xf32>, vector<32x128xf32> -> vector<32x128xf32>
    %31 = arith.addf %25, %30 : vector<32x128xf32>
    %c0_36 = arith.constant 0 : index
    %c0_37 = arith.constant 0 : index
    %32 = vector.load %arg5[%c0_36, %c0_37] : memref<1x128xf32, #tpu.memory_space<vmem>>, vector<1x128xf32>
    %33 = vector.broadcast %32 : vector<1x128xf32> to vector<32x128xf32>
    %34 = arith.addf %31, %33 : vector<32x128xf32>
    %cst_38 = arith.constant 0.000000e+00 : f32
    %35 = vector.broadcast %cst_38 : f32 to vector<32x128xf32>
    %36 = arith.maximumf %34, %35 : vector<32x128xf32>
    %37 = vector.shape_cast %36 : vector<32x128xf32> to vector<2x16x128xf32>
    %c0_39 = arith.constant 0 : index
    %c0_40 = arith.constant 0 : index
    %c0_41 = arith.constant 0 : index
    %38 = vector.load %arg6[%c0_39, %c0_40, %c0_41] : memref<2x16x128xf32, #tpu.memory_space<vmem>>, vector<2x16x128xf32>
    tpu.vector_store %arg6[%c0_39, %c0_40, %c0_41], %37 {strides = array<i32>} : memref<2x16x128xf32, #tpu.memory_space<vmem>>, vector<2x16x128xf32>,
    return
  }
  func.func @transform_0(%arg0: i32) -> (i32, i32, i32) {
    %c0_i32 = arith.constant 0 : i32
    %c0_i32_0 = arith.constant 0 : i32
    %c0_i32_1 = arith.constant 0 : i32
    return %arg0, %c0_i32, %c0_i32_0 : i32, i32, i32
  }
  func.func @transform_1(%arg0: i32) -> (i32, i32) {
    %c0_i32 = arith.constant 0 : i32
    %c0_i32_0 = arith.constant 0 : i32
    %c0_i32_1 = arith.constant 0 : i32
    return %c0_i32, %c0_i32_0 : i32, i32
  }
  func.func @transform_2(%arg0: i32) -> (i32, i32) {
    %c0_i32 = arith.constant 0 : i32
    %c0_i32_0 = arith.constant 0 : i32
    %c0_i32_1 = arith.constant 0 : i32
    return %c0_i32, %c0_i32_0 : i32, i32
  }
  func.func @transform_3(%arg0: i32) -> (i32, i32, i32) {
    %c0_i32 = arith.constant 0 : i32
    %c0_i32_0 = arith.constant 0 : i32
    %c0_i32_1 = arith.constant 0 : i32
    %c0_i32_2 = arith.constant 0 : i32
    return %c0_i32, %c0_i32_0, %c0_i32_1 : i32, i32, i32
  }
  func.func @transform_4(%arg0: i32) -> (i32, i32) {
    %c0_i32 = arith.constant 0 : i32
    %c0_i32_0 = arith.constant 0 : i32
    %c0_i32_1 = arith.constant 0 : i32
    return %c0_i32, %c0_i32_0 : i32, i32
  }
  func.func @transform_5(%arg0: i32) -> (i32, i32, i32) {
    %c0_i32 = arith.constant 0 : i32
    %c0_i32_0 = arith.constant 0 : i32
    %c0_i32_1 = arith.constant 0 : i32
    return %arg0, %c0_i32, %c0_i32_0 : i32, i32, i32
  }
}

</mosaic_0001>

<bundles_post_ra>
// kernel: tpu_custom_call.1
= control target key start
LH: loop header
LB: loop body
LE: loop exit
PB: predicated region body
PF: predicated region fallthrough
CT: control target
= control target key end

     0   :  { %10 = vsyncpa [#allocation4], 0  ;;  %s927_s0 = inlined_call_operand.hbm [shape: f32[2,16,64], index: 0, kind: input, shape index: {}]   ;;  %s928_s1 = inlined_call_operand.hbm [shape: f32[64,128], index: 1, kind: input, shape index: {}]   ;;  %s929_s2 = inlined_call_operand.vmem [shape: f32[1,128], index: 2, kind: input, shape index: {}]   ;;  %s930_s3 = inlined_call_operand.hbm [shape: f32[3,128,128], index: 3, kind: input, shape index: {}]   ;;  %s931_s4 = inlined_call_operand.vmem [shape: f32[1,128], index: 4, kind: input, shape index: {}]   ;;  %s932_s5 = inlined_call_operand.hbm [shape: f32[2,16,128], index: 5, kind: output, shape index: {}]  }
   0x1   :  { %11 = vsyncpa [#allocation7], 0 }
   0x2   :  { %12 = vsyncpa [#allocation5], 0  ;;  %s856_s18 = smov [#allocation6]   ;;  %s857_s20 = smov [#allocation3]  }
   0x3   :  { %s30_s19 = sshll.u32 %s856_s18, 4  ;;  %s18_s21 = sshll.u32 %s857_s20, 4  ;;  %s31_s19 = int_to_ptr.vmem [resolvable:$true] %s30_s19  ;;  %s19_s21 = int_to_ptr.vmem [resolvable:$true] %s18_s21 }
   0x4   :  { %s778_s22 = scalar_lea.vmem %s31_s19, 1024  ;;  %p783_p1 = scmp.lt.s32.totalorder %s31_s19, %s31_s19 }
   0x5   :  { %p779_p0 = scmp.ne.s32.totalorder %s31_s19, %s778_s22  ;;  %p784_p2 = scmp.lt.s32.totalorder %s778_s22, %s778_s22 }
   0x7   :  { %p785_p3 = por %p784_p2, %p783_p1 }
   0x9   :  { %p786_p4 = pnand %p785_p3, %p779_p0 }
   0xb   :  { %789 = shalt.err (!%p786_p4)
}
   0xc   :  { %s858_s23 = smov 128   ;;  %s859_s24 = smov 8  }
   0xd   :  { %36 = dma.hbm_to_vmem [thread:$0]  %s928_s1, 1024, %s31_s19, [#allocation7], %s858_s23, %s858_s23, %s859_s24  }
   0xe   :  { %s798_s27 = scalar_lea.vmem %s19_s21, 512  ;;  %p803_p6 = scmp.lt.s32.totalorder %s19_s21, %s19_s21 }
   0xf   :  { %p799_p5 = scmp.ne.s32.totalorder %s19_s21, %s798_s27  ;;  %p804_p7 = scmp.lt.s32.totalorder %s798_s27, %s798_s27 }
  0x11   :  { %p805_p8 = por %p804_p7, %p803_p6 }
  0x13   :  { %p806_p9 = pnand %p805_p8, %p799_p5 }
  0x15   :  { %809 = shalt.err (!%p806_p9)
}
  0x16   :  { %24 = dma.hbm_to_vmem [thread:$0]  %s927_s0, 512, %s19_s21, [#allocation4], %s858_s23, %s858_s23, %s859_s24  }
  0x17   :  { %s860_s30 = smov [#allocation8]  }
  0x18   :  { %s44_s6 = sshll.u32 %s860_s30, 4  ;;  %s45_s6 = int_to_ptr.vmem [resolvable:$true] %s44_s6 }
  0x19   :  { %s818_s7 = scalar_lea.vmem %s45_s6, 6144  ;;  %p823_p11 = scmp.lt.s32.totalorder %s45_s6, %s45_s6 }
  0x1a   :  { %p819_p10 = scmp.ne.s32.totalorder %s45_s6, %s818_s7  ;;  %p824_p12 = scmp.lt.s32.totalorder %s818_s7, %s818_s7 }
  0x1c   :  { %p825_p13 = por %p824_p12, %p823_p11 }
  0x1e   :  { %p826_p0 = pnand %p825_p13, %p819_p10 }
  0x20   :  { %829 = shalt.err (!%p826_p0)
}
  0x21   :  { %50 = dma.hbm_to_vmem [thread:$0]  %s930_s3, 6144, %s45_s6, [#allocation7], %s858_s23, %s858_s23, %s859_s24  }
  0x22   :  { %850 = dma.done.wait [#allocation4], 512  }
  0x23   :  { %851 = vsyncadd [#allocation4], 4294966784 }
  0x24   :  { %852 = dma.done.wait [#allocation7], 7168  }
  0x25   :  { %853 = vsyncadd [#allocation7], 4294960128  ;;  %v73_v0 = vld [vmem:[#allocation6 + $0x38] sm:$0xff]  ;;  %v72_v1 = vld [vmem:[#allocation6 + $0x30] sm:$0xff]  ;;  %vm81_vm0 = vcmask 523264   ;;  %v861_v40 = vmov 0.0  }
  0x26   :  { %627 = vmatprep.subr.mxu0 %v73_v0  ;;  %v71_v2 = vld [vmem:[#allocation6 + $0x28] sm:$0xff]  ;;  %v62_v3 = vld [vmem:[#allocation3] sm:$0xff]  ;;  %v231_v5 = vld [vmem:[#allocation8 + $0xf8] sm:$0xff]  ;;  %183 = vst [vmem:[#allocation2] sm:$0x1] %v861_v40  ;;  %s862_s10 = smov [#allocation9]  }
  0x27   :  { %628 = vmatpush3.msra.mxu0 %v73_v0  ;;  %643 = vmatprep.mubr.msk.f32.mxu0 %vm81_vm0, %v62_v3  ;;  %v70_v4 = vld [vmem:[#allocation6 + $0x20] sm:$0xff]  ;;  %v230_v6 = vld [vmem:[#allocation8 + $0xf0] sm:$0xff]  ;;  %v69_v7 = vld [vmem:[#allocation6 + $0x18] sm:$0xff]  ;;  %184 = vst [vmem:[#allocation2 + $0x18] sm:$0x1] %v861_v40  ;;  %s536_s11 = sshll.u32 %s862_s10, 4  ;;  %s537_s11 = int_to_ptr.vmem [resolvable:$true] %s536_s11 }
  0x28   :  { %629 = vmatprep.subr.mxu0 %v72_v1  ;;  %649 = vmatprep.subr.mxu1 %v231_v5  ;;  %v229_v8 = vld [vmem:[#allocation8 + $0xe8] sm:$0xff]  ;;  %v68_v9 = vld [vmem:[#allocation6 + $0x10] sm:$0xff]  ;;  %v228_v10 = vld [vmem:[#allocation8 + $0xe0] sm:$0xff]  ;;  %185 = vst [vmem:[#allocation2 + $0x11] sm:$0x1] %v861_v40  ;;  %p835_p2 = scmp.lt.s32.totalorder %s537_s11, %s537_s11 }
  0x29   :  { %630 = vmatpush3.msra.mxu0 %v72_v1  ;;  %650 = vmatpush3.msra.mxu1 %v231_v5  ;;  %v67_v11 = vld [vmem:[#allocation6 + $0x8] sm:$0xff]  ;;  %v227_v12 = vld [vmem:[#allocation8 + $0xd8] sm:$0xff]  ;;  %v66_v13 = vld [vmem:[#allocation6] sm:$0xff]  ;;  %186 = vst [vmem:[#allocation2 + $0x29] sm:$0x1] %v861_v40 }
  0x2a   :  { %631 = vmatprep.subr.mxu0 %v71_v2  ;;  %651 = vmatprep.subr.mxu1 %v230_v6  ;;  %v226_v14 = vld [vmem:[#allocation8 + $0xd0] sm:$0xff]  ;;  %v63_v15 = vld [vmem:[#allocation3 + $0x8] sm:$0xff]  ;;  %v210_v16 = vld [vmem:[#allocation8 + $0x78] sm:$0xff] }
  0x2b   :  { %632 = vmatpush3.msra.mxu0 %v71_v2  ;;  %652 = vmatpush3.msra.mxu1 %v230_v6  ;;  %v64_v17 = vld [vmem:[#allocation3 + $0x10] sm:$0xff]  ;;  %v225_v19 = vld [vmem:[#allocation8 + $0xc8] sm:$0xff]  ;;  %v65_v20 = vld [vmem:[#allocation3 + $0x18] sm:$0xff] }
  0x2c   :  { %633 = vmatprep.subr.mxu0 %v70_v4  ;;  %653 = vmatprep.subr.mxu1 %v229_v8  ;;  %v209_v18 = vld [vmem:[#allocation8 + $0x70] sm:$0xff]  ;;  %v208_v21 = vld [vmem:[#allocation8 + $0x68] sm:$0xff]  ;;  %v224_v22 = vld [vmem:[#allocation8 + $0xc0] sm:$0xff] }
  0x2d   :  { %634 = vmatpush3.msra.mxu0 %v70_v4  ;;  %654 = vmatpush3.msra.mxu1 %v229_v8  ;;  %v207_v23 = vld [vmem:[#allocation8 + $0x60] sm:$0xff]  ;;  %v223_v24 = vld [vmem:[#allocation8 + $0xb8] sm:$0xff]  ;;  %v205_v26 = vld [vmem:[#allocation8 + $0x50] sm:$0xff] }
  0x2e   :  { %635 = vmatprep.subr.mxu0 %v69_v7  ;;  %655 = vmatprep.subr.mxu1 %v228_v10  ;;  %v206_v25 = vld [vmem:[#allocation8 + $0x58] sm:$0xff]  ;;  %v204_v27 = vld [vmem:[#allocation8 + $0x48] sm:$0xff]  ;;  %v203_v28 = vld [vmem:[#allocation8 + $0x40] sm:$0xff] }
  0x2f   :  { %636 = vmatpush3.msra.mxu0 %v69_v7  ;;  %656 = vmatpush3.msra.mxu1 %v228_v10  ;;  %v222_v29 = vld [vmem:[#allocation8 + $0xb0] sm:$0xff]  ;;  %v221_v30 = vld [vmem:[#allocation8 + $0xa8] sm:$0xff]  ;;  %v220_v31 = vld [vmem:[#allocation8 + $0xa0] sm:$0xff] }
  0x30   :  { %637 = vmatprep.subr.mxu0 %v68_v9  ;;  %657 = vmatprep.subr.mxu1 %v227_v12  ;;  %v219_v32 = vld [vmem:[#allocation8 + $0x98] sm:$0xff]  ;;  %v218_v34 = vld [vmem:[#allocation8 + $0x90] sm:$0xff]  ;;  %v217_v36 = vld [vmem:[#allocation8 + $0x88] sm:$0xff] }
  0x31   :  { %638 = vmatpush3.msra.mxu0 %v68_v9  ;;  %658 = vmatpush3.msra.mxu1 %v227_v12  ;;  %v202_v33 = vld [vmem:[#allocation8 + $0x38] sm:$0xff]  ;;  %v201_v35 = vld [vmem:[#allocation8 + $0x30] sm:$0xff]  ;;  %v200_v37 = vld [vmem:[#allocation8 + $0x28] sm:$0xff] }
  0x32   :  { %639 = vmatprep.subr.mxu0 %v67_v11  ;;  %659 = vmatprep.subr.mxu1 %v226_v14  ;;  %v216_v38 = vld [vmem:[#allocation8 + $0x80] sm:$0xff]  ;;  %v422_v41 = vld [vmem:[#allocation8 + $0x178] sm:$0xff]  ;;  %v197_v43 = vld [vmem:[#allocation8 + $0x10] sm:$0xff] }
  0x33   :  { %640 = vmatpush3.msra.mxu0 %v67_v11  ;;  %660 = vmatpush3.msra.mxu1 %v226_v14  ;;  %v199_v39 = vld [vmem:[#allocation8 + $0x20] sm:$0xff]  ;;  %v198_v42 = vld [vmem:[#allocation8 + $0x18] sm:$0xff]  ;;  %v196_v44 = vld [vmem:[#allocation8 + $0x8] sm:$0xff] }
  0x34   :  { %641 = vmatprep.subr.mxu0 %v66_v13  ;;  %661 = vmatprep.subr.mxu1 %v225_v19  ;;  %v195_v45 = vld [vmem:[#allocation8] sm:$0xff]  ;;  %v549_v46 = vld [vmem:[%s929_s2] ss:$0 sm:$0xff]  ;;  %v420_v60 = vld [vmem:[#allocation8 + $0x168] sm:$0xff] }
  0x35   :  { %642 = vmatpush3.msra.mxu0 %v66_v13  ;;  %662 = vmatpush3.msra.mxu1 %v225_v19  ;;  %v421_v58 = vld [vmem:[#allocation8 + $0x170] sm:$0xff]  ;;  %v419_v61 = vld [vmem:[#allocation8 + $0x160] sm:$0xff]  ;;  %v418_v62 = vld [vmem:[#allocation8 + $0x158] sm:$0xff] }
  0x36   :  { %644 = vmatmul.mubr.msk.f32.vlgmr.msra.gmra.mxu0 %vm81_vm0, %v63_v15  ;;  %687 = vmatprep.subr.mxu0 %v210_v16  ;;  %v417_v2 = vld [vmem:[#allocation8 + $0x150] sm:$0xff]  ;;  %v416_v3 = vld [vmem:[#allocation8 + $0x148] sm:$0xff]  ;;  %v415_v6 = vld [vmem:[#allocation8 + $0x140] sm:$0xff] }
  0x37   :  { %646 = vmatprep.mubr.msk.f32.mxu0 %vm81_vm0, %v64_v17  ;;  %688 = vmatpush3.msra.mxu0 %v210_v16  ;;  %v414_v7 = vld [vmem:[#allocation8 + $0x138] sm:$0xff]  ;;  %v413_v8 = vld [vmem:[#allocation8 + $0x130] sm:$0xff]  ;;  %v412_v9 = vld [vmem:[#allocation8 + $0x128] sm:$0xff] }
  0x38   :  { %689 = vmatprep.subr.mxu0 %v209_v18  ;;  %663 = vmatprep.subr.mxu1 %v224_v22  ;;  %v411_v10 = vld [vmem:[#allocation8 + $0x120] sm:$0xff]  ;;  %v410_v11 = vld [vmem:[#allocation8 + $0x118] sm:$0xff]  ;;  %v409_v12 = vld [vmem:[#allocation8 + $0x110] sm:$0xff] }
  0x39   :  { %690 = vmatpush3.msra.mxu0 %v209_v18  ;;  %664 = vmatpush3.msra.mxu1 %v224_v22  ;;  %v408_v13 = vld [vmem:[#allocation8 + $0x108] sm:$0xff]  ;;  %v407_v14 = vld [vmem:[#allocation8 + $0x100] sm:$0xff] }
  0x3a   :  { %647 = vmatmul.mubr.msk.f32.gmra.mxu0 %vm81_vm0, %v65_v20  ;;  %691 = vmatprep.subr.mxu0 %v208_v21 }
  0x3b   :  { %692 = vmatpush3.msra.mxu0 %v208_v21  ;;  %665 = vmatprep.subr.mxu1 %v223_v24 }
  0x3c   :  { %693 = vmatprep.subr.mxu0 %v207_v23  ;;  %666 = vmatpush3.msra.mxu1 %v223_v24 }
  0x3d   :  { %694 = vmatpush3.msra.mxu0 %v207_v23  ;;  %667 = vmatprep.subr.mxu1 %v222_v29 }
  0x3e   :  { %695 = vmatprep.subr.mxu0 %v206_v25  ;;  %668 = vmatpush3.msra.mxu1 %v222_v29 }
  0x3f   :  { %696 = vmatpush3.msra.mxu0 %v206_v25  ;;  %669 = vmatprep.subr.mxu1 %v221_v30 }
  0x40   :  { %697 = vmatprep.subr.mxu0 %v205_v26  ;;  %670 = vmatpush3.msra.mxu1 %v221_v30 }
  0x41   :  { %698 = vmatpush3.msra.mxu0 %v205_v26  ;;  %671 = vmatprep.subr.mxu1 %v220_v31 }
  0x42   :  { %699 = vmatprep.subr.mxu0 %v204_v27  ;;  %672 = vmatpush3.msra.mxu1 %v220_v31 }
  0x43   :  { %700 = vmatpush3.msra.mxu0 %v204_v27  ;;  %673 = vmatprep.subr.mxu1 %v219_v32  ;;  %v554_v27 = vld [vmem:[%s931_s4] ss:$0 sm:$0xff]  ;;  %s830_s4 = scalar_lea.vmem %s537_s11, 512 }
  0x44   :  { %701 = vmatprep.subr.mxu0 %v203_v28  ;;  %674 = vmatpush3.msra.mxu1 %v219_v32  ;;  %p831_p1 = scmp.ne.s32.totalorder %s537_s11, %s830_s4  ;;  %p836_p3 = scmp.lt.s32.totalorder %s830_s4, %s830_s4 }
  0x45   :  { %702 = vmatpush3.msra.mxu0 %v203_v28  ;;  %675 = vmatprep.subr.mxu1 %v218_v34 }
  0x46   :  { %703 = vmatprep.subr.mxu0 %v202_v33  ;;  %676 = vmatpush3.msra.mxu1 %v218_v34  ;;  %p837_p4 = por %p836_p3, %p835_p2 }
  0x47   :  { %704 = vmatpush3.msra.mxu0 %v202_v33  ;;  %677 = vmatprep.subr.mxu1 %v217_v36 }
  0x48   :  { %705 = vmatprep.subr.mxu0 %v201_v35  ;;  %678 = vmatpush3.msra.mxu1 %v217_v36  ;;  %p838_p5 = pnand %p837_p4, %p831_p1 }
  0x49   :  { %706 = vmatpush3.msra.mxu0 %v201_v35  ;;  %679 = vmatprep.subr.mxu1 %v216_v38 }
  0x4a   :  { %707 = vmatprep.subr.mxu0 %v200_v37  ;;  %680 = vmatpush3.msra.mxu1 %v216_v38 }
  0x4b   :  { %708 = vmatpush3.msra.mxu0 %v200_v37  ;;  %725 = vmatprep.subr.mxu1 %v422_v41 }
  0x4c   :  { %709 = vmatprep.subr.mxu0 %v199_v39 }
  0x4d   :  { %710 = vmatpush3.msra.mxu0 %v199_v39 }
  0x4e   :  { %711 = vmatprep.subr.mxu0 %v198_v42 }
  0x4f   :  { %712 = vmatpush3.msra.mxu0 %v198_v42 }
  0x50   :  { %713 = vmatprep.subr.mxu0 %v197_v43 }
  0x51   :  { %714 = vmatpush3.msra.mxu0 %v197_v43 }
  0x52   :  { %715 = vmatprep.subr.mxu0 %v196_v44 }
  0x53   :  { %716 = vmatpush3.msra.mxu0 %v196_v44 }
  0x54   :  { %717 = vmatprep.subr.mxu0 %v195_v45 }
  0x55   :  { %718 = vmatpush3.msra.mxu0 %v195_v45 }
  0xf6   :  { %v645_v47 = vpop.f32.mrf.mxu0 }
  0xf7   :  { %v166_v48 = vadd.f32 %v645_v47, %v549_v46 }
  0xf8   :  { %v160_v49 = vpop.f32.mrf.mxu0 }
  0xf9   :  { %v180_v50 = vmax.f32 %v166_v48, 0.0  ;;  %v161_v51 = vadd.f32 %v549_v46, %v160_v49 }
  0xfa   :  { %v648_v52 = vpop.f32.mrf.mxu0 }
  0xfb   :  { %188 = vst [vmem:[#allocation2 + $0x9] sm:$0xff] %v180_v50  ;;  %v179_v53 = vmax.f32 %v161_v51, 0.0  ;;  %v176_v54 = vadd.f32 %v648_v52, %v549_v46 }
  0xfc   :  { %v170_v55 = vpop.f32.mrf.mxu0 }
  0xfd   :  { %187 = vst [vmem:[#allocation2 + $0x1] sm:$0xff] %v179_v53  ;;  %v182_v56 = vmax.f32 %v176_v54, 0.0  ;;  %v171_v57 = vadd.f32 %v549_v46, %v170_v55  ;;  %681 = vmatprep.mubr.f32.mxu1 %v179_v53 }
  0xfe   :  { %682 = vmatmul.mubr.f32.vlgmr.msra.gmra.mxu1 %v180_v50 }
  0xff   :  { %190 = vst [vmem:[#allocation2 + $0x21] sm:$0xff] %v182_v56  ;;  %v181_v59 = vmax.f32 %v171_v57, 0.0  ;;  %726 = vmatpush3.msra.mxu1 %v422_v41 }
 0x100   :  { %727 = vmatprep.subr.mxu1 %v421_v58 }
 0x101   :  { %189 = vst [vmem:[#allocation2 + $0x19] sm:$0xff] %v181_v59  ;;  %728 = vmatpush3.msra.mxu1 %v421_v58  ;;  %684 = vmatprep.mubr.f32.mxu1 %v181_v59 }
 0x102   :  { %729 = vmatprep.subr.mxu1 %v420_v60  ;;  %685 = vmatmul.mubr.f32.gmra.mxu1 %v182_v56  ;;  %v403_v15 = vld [vmem:[#allocation2 + $0xa] sm:$0xff] }
 0x103   :  { %730 = vmatpush3.msra.mxu1 %v420_v60 }
 0x104   :  { %v191_v63 = vld [vmem:[#allocation2] sm:$0xff]  ;;  %v192_v0 = vld [vmem:[#allocation2 + $0x8] sm:$0xff]  ;;  %731 = vmatprep.subr.mxu1 %v419_v61 }
 0x105   :  { %v402_v1 = vld [vmem:[#allocation2 + $0x2] sm:$0xff]  ;;  %719 = vmatprep.mubr.f32.mxu0 %v191_v63  ;;  %732 = vmatpush3.msra.mxu1 %v419_v61 }
 0x106   :  { %757 = vmatprep.mubr.f32.mxu1 %v402_v1  ;;  %720 = vmatmul.mubr.f32.vlgmr.msra.gmra.mxu0 %v192_v0  ;;  %v405_v17 = vld [vmem:[#allocation2 + $0x22] sm:$0xff] }
 0x107   :  { %733 = vmatprep.subr.mxu1 %v418_v62 }
 0x108   :  { %734 = vmatpush3.msra.mxu1 %v418_v62  ;;  %v193_v4 = vld [vmem:[#allocation2 + $0x18] sm:$0xff]  ;;  %v194_v5 = vld [vmem:[#allocation2 + $0x20] sm:$0xff] }
 0x109   :  { %735 = vmatprep.subr.mxu1 %v417_v2  ;;  %722 = vmatprep.mubr.f32.mxu0 %v193_v4  ;;  %v404_v16 = vld [vmem:[#allocation2 + $0x1a] sm:$0xff] }
 0x10a   :  { %736 = vmatpush3.msra.mxu1 %v417_v2  ;;  %723 = vmatmul.mubr.f32.gmra.mxu0 %v194_v5 }
 0x10b   :  { %737 = vmatprep.subr.mxu1 %v416_v3 }
 0x10c   :  { %738 = vmatpush3.msra.mxu1 %v416_v3 }
 0x10d   :  { %739 = vmatprep.subr.mxu1 %v415_v6 }
 0x10e   :  { %740 = vmatpush3.msra.mxu1 %v415_v6 }
 0x10f   :  { %741 = vmatprep.subr.mxu1 %v414_v7 }
 0x110   :  { %742 = vmatpush3.msra.mxu1 %v414_v7 }
 0x111   :  { %743 = vmatprep.subr.mxu1 %v413_v8 }
 0x112   :  { %744 = vmatpush3.msra.mxu1 %v413_v8 }
 0x113   :  { %745 = vmatprep.subr.mxu1 %v412_v9 }
 0x114   :  { %746 = vmatpush3.msra.mxu1 %v412_v9 }
 0x115   :  { %747 = vmatprep.subr.mxu1 %v411_v10 }
 0x116   :  { %748 = vmatpush3.msra.mxu1 %v411_v10 }
 0x117   :  { %749 = vmatprep.subr.mxu1 %v410_v11 }
 0x118   :  { %750 = vmatpush3.msra.mxu1 %v410_v11 }
 0x119   :  { %751 = vmatprep.subr.mxu1 %v409_v12 }
 0x11a   :  { %752 = vmatpush3.msra.mxu1 %v409_v12 }
 0x11b   :  { %753 = vmatprep.subr.mxu1 %v408_v13 }
 0x11c   :  { %754 = vmatpush3.msra.mxu1 %v408_v13 }
 0x11d   :  { %755 = vmatprep.subr.mxu1 %v407_v14 }
 0x11e   :  { %756 = vmatpush3.msra.mxu1 %v407_v14 }
 0x11f   :  { %758 = vmatmul.mubr.f32.vlgmr.msra.gmra.mxu1 %v403_v15 }
 0x120   :  { %760 = vmatprep.mubr.f32.mxu1 %v404_v16 }
 0x123   :  { %761 = vmatmul.mubr.f32.gmra.mxu1 %v405_v17 }
 0x1be   :  { %v683_v18 = vpop.f32.mrf.mxu1 }
 0x1c0   :  { %v298_v20 = vpop.f32.mrf.mxu1 }
 0x1c2   :  { %v686_v21 = vpop.f32.mrf.mxu1 }
 0x1c4   :  { %v308_v24 = vpop.f32.mrf.mxu1 }
 0x1c6   :  { %v721_v19 = vpop.f32.mrf.mxu0 }
 0x1c7   :  { %v389_v25 = vadd.f32 %v721_v19, %v683_v18 }
 0x1c8   :  { %v383_v22 = vpop.f32.mrf.mxu0 }
 0x1c9   :  { %v384_v28 = vadd.f32 %v383_v22, %v298_v20 }
 0x1ca   :  { %v724_v23 = vpop.f32.mrf.mxu0 }
 0x1cb   :  { %v399_v32 = vadd.f32 %v724_v23, %v686_v21 }
 0x1cc   :  { %v393_v30 = vpop.f32.mrf.mxu0 }
 0x1cd   :  { %v394_v36 = vadd.f32 %v393_v30, %v308_v24 }
 0x1df   :  { %v759_v26 = vpop.f32.mrf.mxu1 }
 0x1e0   :  { %v509_v29 = vadd.f32 %v759_v26, %v389_v25 }
 0x1e1   :  { %v489_v31 = vpop.f32.mrf.mxu1 }
 0x1e2   :  { %v520_v33 = vadd.f32 %v554_v27, %v509_v29  ;;  %v508_v34 = vadd.f32 %v489_v31, %v384_v28 }
 0x1e3   :  { %v762_v35 = vpop.f32.mrf.mxu1 }
 0x1e4   :  { %v524_v37 = vmax.f32 %v520_v33, 0.0  ;;  %v519_v38 = vadd.f32 %v554_v27, %v508_v34  ;;  %v511_v39 = vadd.f32 %v762_v35, %v399_v32 }
 0x1e5   :  { %v499_v40 = vpop.f32.mrf.mxu1 }
 0x1e6   :  { %528 = vst [vmem:[#allocation9 + $0x8] sm:$0xff] %v524_v37  ;;  %v523_v41 = vmax.f32 %v519_v38, 0.0  ;;  %v522_v42 = vadd.f32 %v554_v27, %v511_v39  ;;  %v510_v43 = vadd.f32 %v499_v40, %v394_v36 }
 0x1e8   :  { %527 = vst [vmem:[#allocation9] sm:$0xff] %v523_v41  ;;  %v526_v44 = vmax.f32 %v522_v42, 0.0  ;;  %v521_v45 = vadd.f32 %v554_v27, %v510_v43 }
 0x1ea   :  { %530 = vst [vmem:[#allocation9 + $0x18] sm:$0xff] %v526_v44  ;;  %v525_v46 = vmax.f32 %v521_v45, 0.0 }
 0x1ec   :  { %529 = vst [vmem:[#allocation9 + $0x10] sm:$0xff] %v525_v46 }
 0x1ed   :  { %841 = shalt.err (!%p838_p5)
}
 0x1ee   :  { %542 = dma.vmem_to_hbm [thread:$0]  %s537_s11, 512, %s932_s5, [#allocation5], %s858_s23, %s858_s23, %s859_s24  }
 0x1ef   :  { %854 = dma.done.wait [#allocation5], 512  }
 0x1f0   :  { %855 = vsyncadd [#allocation5], 4294966784 }
 0x1f1   :  { %546 = vsyncpa [#allocation4], 1 }
 0x1f2   :  { %547 = vsyncpa [#allocation7], 1 }
 0x1f3   :  { %548 = vsyncpa [#allocation5], 1 }

</bundles_post_ra>
